<compile_context>
chip_gen: v7x
topology: tpu7x:2x2x1
jax: 0.10.0
libtpu: 0.0.40
codegen_flags: <defaults>
</compile_context>

<pallas_src>
import functools

import jax
import jax.numpy as jnp
from jax.experimental import pallas as pl
from jax.experimental.pallas import tpu as pltpu


# ---------------------------------------------------------------------------
# Fused Pallas kernel: Conv2d(3x3, pad=1) + ReLU + Flatten + Linear
# ---------------------------------------------------------------------------
def fused_forward_kernel(x_ref, wblk_ref, cb_ref, fcw_ref, fcb_ref, o_ref,
                         buf_ref, *, batch, height, width, lpad):
    """Whole-batch fused forward pass (single grid step).

    x_ref:    (B*Cin, H*W)             NCHW input, rows = b*Cin + ci
    wblk_ref: (9, B*Cout, B*Cin)       per-tap block-diagonal conv weights
    cb_ref:   (B*Cout, 1)              conv bias, rows = b*Cout + co
    fcw_ref:  (Cout, C, H*W)           lane-dense classifier weight
    fcb_ref:  (1, C)                   classifier bias
    o_ref:    (B, C)                   logits
    buf_ref:  (B*Cin, lpad+H*W+lpad)   VMEM halo buffer
    """
    B = batch
    H, W = height, width
    HW = H * W
    BCin = x_ref.shape[0]
    BCout = wblk_ref.shape[1]
    Cout, C, _ = fcw_ref.shape

    # ---- halo staging: zero only the pad regions, aligned center store ------
    pad_zeros = jnp.zeros((BCin, lpad), jnp.float32)
    buf_ref[:, 0:lpad] = pad_zeros                         # left halo
    buf_ref[:, lpad + HW:lpad + HW + lpad] = pad_zeros     # right halo
    buf_ref[:, lpad:lpad + HW] = x_ref[...]                # aligned 256-lane store

    # Column-validity masks for horizontal taps (dx = -1 / +1); vertical
    # out-of-range rows are already zero thanks to the halo regions.
    lane = jax.lax.broadcasted_iota(jnp.int32, (BCin, HW), 1)
    col = lane & (W - 1)                                   # W is a power of two
    left_ok = col >= 1                                     # dx = -1 needs x-1 >= 0
    right_ok = col <= W - 2                                # dx = +1 needs x+1 <  W

    # ---- conv: 9 whole-batch taps x block-diagonal weights ------------------
    # acc rows = b*Cout + co, lanes = H*W  (== PyTorch NCHW-flatten order)
    acc = jnp.zeros((BCout, HW), jnp.float32)
    for t in range(9):
        ky, kx = t // 3, t % 3
        dy, dx = ky - 1, kx - 1
        start = lpad + dy * W + dx                         # static lane offset
        p = buf_ref[:, start:start + HW]                   # (B*Cin, HW)
        if dx == -1:
            p = jnp.where(left_ok, p, 0.0)
        elif dx == 1:
            p = jnp.where(right_ok, p, 0.0)
        acc = acc + jnp.dot(wblk_ref[t], p,                # (B*Cout, B*Cin) @ (B*Cin, HW)
                            preferred_element_type=jnp.float32)

    conv = jnp.maximum(acc + cb_ref[...], 0.0)             # bias + ReLU, (B*Cout, HW)
    # Rows 0..Cout-1 are sample 0, rows Cout..2*Cout-1 are sample 1, ... so this
    # regroup is tile-aligned (Cout == 8 sublanes) and costs no relayout.
    feat = conv.reshape(B, Cout, HW)

    # ---- classifier: accumulate per-channel contract-last matmuls -----------
    logits = jnp.zeros((B, C), jnp.float32)
    for co in range(Cout):
        f_co = feat[:, co, :]                              # (B, HW)
        w_co = fcw_ref[co]                                 # (C, HW), lane-dense
        logits = logits + jax.lax.dot_general(
            f_co, w_co, (((1,), (1,)), ((), ())),          # contract HW vs HW
            preferred_element_type=jnp.float32)
    o_ref[...] = logits + fcb_ref[...]


# ---------------------------------------------------------------------------
# Wrapper
# ---------------------------------------------------------------------------
def decoupled_model_forward(x_nchw, prep):
    """forward(x) = classifier(base(x)) as a single fused Pallas kernel."""
    B, Cin, H, W = x_nchw.shape
    HW = H * W
    Cout, C, _ = prep["fc_w"].shape
    BCin = B * Cin
    BCout = B * Cout
    LPAD = 128                                   # lane-aligned halo, >= W+1

    assert W & (W - 1) == 0, "kernel computes the column index with & (W-1)"
    assert LPAD >= W + 1
    assert prep["conv_wblk"].shape == (9, BCout, BCin), \
        "block-diagonal conv weights must be packed for this batch size"

    x_flat = x_nchw.reshape(BCin, HW)            # free bitcast (row-major)

    kernel = functools.partial(fused_forward_kernel,
                               batch=B, height=H, width=W, lpad=LPAD)
    flops = 2 * B * Cout * HW * 9 * Cin + 2 * B * Cout * HW * C
    bytes_accessed = 4 * (BCin * HW + 9 * BCout * BCin + BCout
                          + Cout * C * HW + C + B * C)
    return pl.pallas_call(
        kernel,
        out_shape=jax.ShapeDtypeStruct((B, C), jnp.float32),
        in_specs=[
            pl.BlockSpec((BCin, HW), lambda: (0, 0)),
            pl.BlockSpec((9, BCout, BCin), lambda: (0, 0, 0)),
            pl.BlockSpec((BCout, 1), lambda: (0, 0)),
            pl.BlockSpec((Cout, C, HW), lambda: (0, 0, 0)),
            pl.BlockSpec((1, C), lambda: (0, 0)),
        ],
        out_specs=pl.BlockSpec((B, C), lambda: (0, 0)),
        scratch_shapes=[
            pltpu.VMEM((BCin, LPAD + HW + LPAD), jnp.float32),   # halo buffer
        ],
        cost_estimate=pl.CostEstimate(flops=flops, transcendentals=0,
                                      bytes_accessed=bytes_accessed),
    )(x_flat, prep["conv_wblk"], prep["conv_b_blk"], prep["fc_w"], prep["fc_b"])


# ---------------------------------------------------------------------------
# Parameters (synthetic, deterministic) and one-time repack for the kernel
# ---------------------------------------------------------------------------
def init_params(key, cin=4, cout=8, h=16, w=16, num_classes=10):
    k1, k2, k3, k4 = jax.random.split(key, 4)
    fan_in_conv = cin * 3 * 3
    fan_in_fc = cout * h * w
    return {
        # conv weight stored HWIO: (kH, kW, Cin, Cout)
        "conv_w": jax.random.normal(k1, (3, 3, cin, cout), jnp.float32)
        / jnp.sqrt(fan_in_conv),
        "conv_b": jax.random.normal(k2, (cout,), jnp.float32) * 0.01,
        # linear weight stored transposed vs torch: (in_features, out_features)
        "fc_w": jax.random.normal(k3, (fan_in_fc, num_classes), jnp.float32)
        / jnp.sqrt(fan_in_fc),
        "fc_b": jax.random.normal(k4, (num_classes,), jnp.float32) * 0.01,
    }


def prepare_params(params, batch_size):
    """One-time repack of the weights into kernel-friendly layouts."""
    conv_w = params["conv_w"]                          # (3, 3, Cin, Cout) HWIO
    kh, kw, cin, cout = conv_w.shape
    # per-tap (Cout, Cin), tap order t = ky*kw + kx (matches kernel tap loop)
    w_taps = conv_w.transpose(0, 1, 3, 2).reshape(kh * kw, cout, cin)
    eye_b = jnp.eye(batch_size, dtype=conv_w.dtype)
    # block-diag: wblk[t, b*Cout+co, b'*Cin+ci] = w_taps[t, co, ci] * (b == b')
    wblk = jnp.einsum("toi,bd->tbodi", w_taps, eye_b).reshape(
        kh * kw, batch_size * cout, batch_size * cin)

    fc_w = params["fc_w"]                              # (Cout*H*W, C)
    feat_dim, num_classes = fc_w.shape
    hw = feat_dim // cout
    # lane-dense repack: fcw_r[co, c, s] = fc_w[co*HW + s, c]
    fcw_r = fc_w.reshape(cout, hw, num_classes).transpose(0, 2, 1)

    return {
        "conv_wblk": wblk,                                        # (9, B*Cout, B*Cin)
        "conv_b_blk": jnp.tile(params["conv_b"],
                               (batch_size,)).reshape(batch_size * cout, 1),
        "fc_w": fcw_r,                                            # (Cout, C, HW)
        "fc_b": params["fc_b"].reshape(1, -1),                    # (1, C)
    }


if __name__ == "__main__":
    key = jax.random.PRNGKey(0)
    kx_, kp = jax.random.split(key)

    B, Cin, H, W = 2, 4, 16, 16
    NUM_CLASSES = 10
    x = jax.random.normal(kx_, (B, Cin, H, W), jnp.float32)   # NCHW, like torch
    params = init_params(kp, cin=Cin, h=H, w=W, num_classes=NUM_CLASSES)
    prep = prepare_params(params, batch_size=B)

    fwd = jax.jit(decoupled_model_forward)
    out = jax.block_until_ready(fwd(x, prep))

    # reference in plain JAX (conv + ReLU, NCHW flatten, linear)
    x_nhwc = jnp.transpose(x, (0, 2, 3, 1))
    ref_conv = jax.lax.conv_general_dilated(
        x_nhwc, params["conv_w"], (1, 1), "SAME",
        dimension_numbers=("NHWC", "HWIO", "NHWC")) + params["conv_b"]
    ref_conv = jnp.maximum(ref_conv, 0.0)
    ref_feat = jnp.transpose(ref_conv, (0, 3, 1, 2)).reshape(B, -1)
    ref_out = ref_feat @ params["fc_w"] + params["fc_b"]

    assert out.shape == (B, NUM_CLASSES)
    assert jnp.allclose(out, ref_out, atol=1e-4, rtol=1e-4)

    print("KERNEL_OK")
</pallas_src>

<mosaic_0001>
module attributes {stable_mosaic.version = 11 : i64} {
  func.func @fused_forward_kernel(%arg0: memref<8x256xf32, #tpu.memory_space<vmem>>, %arg1: memref<9x16x8xf32, #tpu.memory_space<vmem>>, %arg2: memref<16x1xf32, #tpu.memory_space<vmem>>, %arg3: memref<8x10x256xf32, #tpu.memory_space<vmem>>, %arg4: memref<1x10xf32, #tpu.memory_space<vmem>>, %arg5: memref<2x10xf32, #tpu.memory_space<vmem>>, %arg6: memref<8x512xf32, #tpu.memory_space<vmem>>) attributes {dimension_semantics = [], scalar_prefetch = 0 : i64, scratch_operands = 1 : i64, tpu.core_type = #tpu.core_type<tc>} {
    %cst = arith.constant 0.000000e+00 : f32
    %0 = vector.broadcast %cst : f32 to vector<8x128xf32>
    %c0 = arith.constant 0 : index
    %c0_0 = arith.constant 0 : index
    %1 = vector.load %arg6[%c0, %c0_0] : memref<8x512xf32, #tpu.memory_space<vmem>>, vector<8x128xf32>
    tpu.vector_store %arg6[%c0, %c0_0], %0 {strides = array<i32>} : memref<8x512xf32, #tpu.memory_space<vmem>>, vector<8x128xf32>,
    %c0_1 = arith.constant 0 : index
    %c384 = arith.constant 384 : index
    %2 = vector.load %arg6[%c0_1, %c384] : memref<8x512xf32, #tpu.memory_space<vmem>>, vector<8x128xf32>
    tpu.vector_store %arg6[%c0_1, %c384], %0 {strides = array<i32>} : memref<8x512xf32, #tpu.memory_space<vmem>>, vector<8x128xf32>,
    %c0_2 = arith.constant 0 : index
    %c0_3 = arith.constant 0 : index
    %3 = vector.load %arg0[%c0_2, %c0_3] : memref<8x256xf32, #tpu.memory_space<vmem>>, vector<8x256xf32>
    %c0_4 = arith.constant 0 : index
    %c128 = arith.constant 128 : index
    %4 = vector.load %arg6[%c0_4, %c128] : memref<8x512xf32, #tpu.memory_space<vmem>>, vector<8x256xf32>
    tpu.vector_store %arg6[%c0_4, %c128], %3 {strides = array<i32>} : memref<8x512xf32, #tpu.memory_space<vmem>>, vector<8x256xf32>,
    %5 = tpu.iota {dimensions = array<i32: 1>} : vector<8x256xi32>
    %c15_i32 = arith.constant 15 : i32
    %6 = vector.broadcast %c15_i32 : i32 to vector<8x256xi32>
    %7 = arith.andi %5, %6 : vector<8x256xi32>
    %c1_i32 = arith.constant 1 : i32
    %8 = vector.broadcast %c1_i32 : i32 to vector<8x256xi32>
    %9 = arith.cmpi sge, %7, %8 : vector<8x256xi32>
    %c14_i32 = arith.constant 14 : i32
    %10 = vector.broadcast %c14_i32 : i32 to vector<8x256xi32>
    %11 = arith.cmpi sle, %7, %10 : vector<8x256xi32>
    %cst_5 = arith.constant 0.000000e+00 : f32
    %12 = vector.broadcast %cst_5 : f32 to vector<16x256xf32>
    %c0_6 = arith.constant 0 : index
    %c111 = arith.constant 111 : index
    %13 = vector.load %arg6[%c0_6, %c111] : memref<8x512xf32, #tpu.memory_space<vmem>>, vector<8x256xf32>
    %cst_7 = arith.constant 0.000000e+00 : f32
    %14 = vector.broadcast %cst_7 : f32 to vector<8x256xf32>
    %15 = arith.select %9, %13, %14 : vector<8x256xi1>, vector<8x256xf32>
    %c0_8 = arith.constant 0 : index
    %c0_9 = arith.constant 0 : index
    %c0_10 = arith.constant 0 : index
    %16 = vector.load %arg1[%c0_8, %c0_9, %c0_10] : memref<9x16x8xf32, #tpu.memory_space<vmem>>, vector<1x16x8xf32>
    %17 = vector.shape_cast %16 : vector<1x16x8xf32> to vector<16x8xf32>
    %cst_11 = arith.constant dense<0.000000e+00> : vector<16x256xf32>
    %18 = tpu.matmul %17, %15, %cst_11 {dimension_numbers = #tpu.dot_dimension_numbers<[1], [0], [0], [1], [0, 0, 1, 1], [], []>} : vector<16x8xf32>, vector<8x256xf32>, vector<16x256xf32> -> vector<16x256xf32>
    %19 = arith.addf %12, %18 : vector<16x256xf32>
    %c0_12 = arith.constant 0 : index
    %c112 = arith.constant 112 : index
    %20 = vector.load %arg6[%c0_12, %c112] : memref<8x512xf32, #tpu.memory_space<vmem>>, vector<8x256xf32>
    %c1 = arith.constant 1 : index
    %c0_13 = arith.constant 0 : index
    %c0_14 = arith.constant 0 : index
    %21 = vector.load %arg1[%c1, %c0_13, %c0_14] : memref<9x16x8xf32, #tpu.memory_space<vmem>>, vector<1x16x8xf32>
    %22 = vector.shape_cast %21 : vector<1x16x8xf32> to vector<16x8xf32>
    %cst_15 = arith.constant dense<0.000000e+00> : vector<16x256xf32>
    %23 = tpu.matmul %22, %20, %cst_15 {dimension_numbers = #tpu.dot_dimension_numbers<[1], [0], [0], [1], [0, 0, 1, 1], [], []>} : vector<16x8xf32>, vector<8x256xf32>, vector<16x256xf32> -> vector<16x256xf32>
    %24 = arith.addf %19, %23 : vector<16x256xf32>
    %c0_16 = arith.constant 0 : index
    %c113 = arith.constant 113 : index
    %25 = vector.load %arg6[%c0_16, %c113] : memref<8x512xf32, #tpu.memory_space<vmem>>, vector<8x256xf32>
    %cst_17 = arith.constant 0.000000e+00 : f32
    %26 = vector.broadcast %cst_17 : f32 to vector<8x256xf32>
    %27 = arith.select %11, %25, %26 : vector<8x256xi1>, vector<8x256xf32>
    %c2 = arith.constant 2 : index
    %c0_18 = arith.constant 0 : index
    %c0_19 = arith.constant 0 : index
    %28 = vector.load %arg1[%c2, %c0_18, %c0_19] : memref<9x16x8xf32, #tpu.memory_space<vmem>>, vector<1x16x8xf32>
    %29 = vector.shape_cast %28 : vector<1x16x8xf32> to vector<16x8xf32>
    %cst_20 = arith.constant dense<0.000000e+00> : vector<16x256xf32>
    %30 = tpu.matmul %29, %27, %cst_20 {dimension_numbers = #tpu.dot_dimension_numbers<[1], [0], [0], [1], [0, 0, 1, 1], [], []>} : vector<16x8xf32>, vector<8x256xf32>, vector<16x256xf32> -> vector<16x256xf32>
    %31 = arith.addf %24, %30 : vector<16x256xf32>
    %c0_21 = arith.constant 0 : index
    %c127 = arith.constant 127 : index
    %32 = vector.load %arg6[%c0_21, %c127] : memref<8x512xf32, #tpu.memory_space<vmem>>, vector<8x256xf32>
    %cst_22 = arith.constant 0.000000e+00 : f32
    %33 = vector.broadcast %cst_22 : f32 to vector<8x256xf32>
    %34 = arith.select %9, %32, %33 : vector<8x256xi1>, vector<8x256xf32>
    %c3 = arith.constant 3 : index
    %c0_23 = arith.constant 0 : index
    %c0_24 = arith.constant 0 : index
    %35 = vector.load %arg1[%c3, %c0_23, %c0_24] : memref<9x16x8xf32, #tpu.memory_space<vmem>>, vector<1x16x8xf32>
    %36 = vector.shape_cast %35 : vector<1x16x8xf32> to vector<16x8xf32>
    %cst_25 = arith.constant dense<0.000000e+00> : vector<16x256xf32>
    %37 = tpu.matmul %36, %34, %cst_25 {dimension_numbers = #tpu.dot_dimension_numbers<[1], [0], [0], [1], [0, 0, 1, 1], [], []>} : vector<16x8xf32>, vector<8x256xf32>, vector<16x256xf32> -> vector<16x256xf32>
    %38 = arith.addf %31, %37 : vector<16x256xf32>
    %c0_26 = arith.constant 0 : index
    %c128_27 = arith.constant 128 : index
    %39 = vector.load %arg6[%c0_26, %c128_27] : memref<8x512xf32, #tpu.memory_space<vmem>>, vector<8x256xf32>
    %c4 = arith.constant 4 : index
    %c0_28 = arith.constant 0 : index
    %c0_29 = arith.constant 0 : index
    %40 = vector.load %arg1[%c4, %c0_28, %c0_29] : memref<9x16x8xf32, #tpu.memory_space<vmem>>, vector<1x16x8xf32>
    %41 = vector.shape_cast %40 : vector<1x16x8xf32> to vector<16x8xf32>
    %cst_30 = arith.constant dense<0.000000e+00> : vector<16x256xf32>
    %42 = tpu.matmul %41, %39, %cst_30 {dimension_numbers = #tpu.dot_dimension_numbers<[1], [0], [0], [1], [0, 0, 1, 1], [], []>} : vector<16x8xf32>, vector<8x256xf32>, vector<16x256xf32> -> vector<16x256xf32>
    %43 = arith.addf %38, %42 : vector<16x256xf32>
    %c0_31 = arith.constant 0 : index
    %c129 = arith.constant 129 : index
    %44 = vector.load %arg6[%c0_31, %c129] : memref<8x512xf32, #tpu.memory_space<vmem>>, vector<8x256xf32>
    %cst_32 = arith.constant 0.000000e+00 : f32
    %45 = vector.broadcast %cst_32 : f32 to vector<8x256xf32>
    %46 = arith.select %11, %44, %45 : vector<8x256xi1>, vector<8x256xf32>
    %c5 = arith.constant 5 : index
    %c0_33 = arith.constant 0 : index
    %c0_34 = arith.constant 0 : index
    %47 = vector.load %arg1[%c5, %c0_33, %c0_34] : memref<9x16x8xf32, #tpu.memory_space<vmem>>, vector<1x16x8xf32>
    %48 = vector.shape_cast %47 : vector<1x16x8xf32> to vector<16x8xf32>
    %cst_35 = arith.constant dense<0.000000e+00> : vector<16x256xf32>
    %49 = tpu.matmul %48, %46, %cst_35 {dimension_numbers = #tpu.dot_dimension_numbers<[1], [0], [0], [1], [0, 0, 1, 1], [], []>} : vector<16x8xf32>, vector<8x256xf32>, vector<16x256xf32> -> vector<16x256xf32>
    %50 = arith.addf %43, %49 : vector<16x256xf32>
    %c0_36 = arith.constant 0 : index
    %c143 = arith.constant 143 : index
    %51 = vector.load %arg6[%c0_36, %c143] : memref<8x512xf32, #tpu.memory_space<vmem>>, vector<8x256xf32>
    %cst_37 = arith.constant 0.000000e+00 : f32
    %52 = vector.broadcast %cst_37 : f32 to vector<8x256xf32>
    %53 = arith.select %9, %51, %52 : vector<8x256xi1>, vector<8x256xf32>
    %c6 = arith.constant 6 : index
    %c0_38 = arith.constant 0 : index
    %c0_39 = arith.constant 0 : index
    %54 = vector.load %arg1[%c6, %c0_38, %c0_39] : memref<9x16x8xf32, #tpu.memory_space<vmem>>, vector<1x16x8xf32>
    %55 = vector.shape_cast %54 : vector<1x16x8xf32> to vector<16x8xf32>
    %cst_40 = arith.constant dense<0.000000e+00> : vector<16x256xf32>
    %56 = tpu.matmul %55, %53, %cst_40 {dimension_numbers = #tpu.dot_dimension_numbers<[1], [0], [0], [1], [0, 0, 1, 1], [], []>} : vector<16x8xf32>, vector<8x256xf32>, vector<16x256xf32> -> vector<16x256xf32>
    %57 = arith.addf %50, %56 : vector<16x256xf32>
    %c0_41 = arith.constant 0 : index
    %c144 = arith.constant 144 : index
    %58 = vector.load %arg6[%c0_41, %c144] : memref<8x512xf32, #tpu.memory_space<vmem>>, vector<8x256xf32>
    %c7 = arith.constant 7 : index
    %c0_42 = arith.constant 0 : index
    %c0_43 = arith.constant 0 : index
    %59 = vector.load %arg1[%c7, %c0_42, %c0_43] : memref<9x16x8xf32, #tpu.memory_space<vmem>>, vector<1x16x8xf32>
    %60 = vector.shape_cast %59 : vector<1x16x8xf32> to vector<16x8xf32>
    %cst_44 = arith.constant dense<0.000000e+00> : vector<16x256xf32>
    %61 = tpu.matmul %60, %58, %cst_44 {dimension_numbers = #tpu.dot_dimension_numbers<[1], [0], [0], [1], [0, 0, 1, 1], [], []>} : vector<16x8xf32>, vector<8x256xf32>, vector<16x256xf32> -> vector<16x256xf32>
    %62 = arith.addf %57, %61 : vector<16x256xf32>
    %c0_45 = arith.constant 0 : index
    %c145 = arith.constant 145 : index
    %63 = vector.load %arg6[%c0_45, %c145] : memref<8x512xf32, #tpu.memory_space<vmem>>, vector<8x256xf32>
    %cst_46 = arith.constant 0.000000e+00 : f32
    %64 = vector.broadcast %cst_46 : f32 to vector<8x256xf32>
    %65 = arith.select %11, %63, %64 : vector<8x256xi1>, vector<8x256xf32>
    %c8 = arith.constant 8 : index
    %c0_47 = arith.constant 0 : index
    %c0_48 = arith.constant 0 : index
    %66 = vector.load %arg1[%c8, %c0_47, %c0_48] : memref<9x16x8xf32, #tpu.memory_space<vmem>>, vector<1x16x8xf32>
    %67 = vector.shape_cast %66 : vector<1x16x8xf32> to vector<16x8xf32>
    %cst_49 = arith.constant dense<0.000000e+00> : vector<16x256xf32>
    %68 = tpu.matmul %67, %65, %cst_49 {dimension_numbers = #tpu.dot_dimension_numbers<[1], [0], [0], [1], [0, 0, 1, 1], [], []>} : vector<16x8xf32>, vector<8x256xf32>, vector<16x256xf32> -> vector<16x256xf32>
    %69 = arith.addf %62, %68 : vector<16x256xf32>
    %c0_50 = arith.constant 0 : index
    %c0_51 = arith.constant 0 : index
    %70 = vector.load %arg2[%c0_50, %c0_51] : memref<16x1xf32, #tpu.memory_space<vmem>>, vector<16x1xf32>
    %71 = vector.broadcast %70 : vector<16x1xf32> to vector<16x256xf32>
    %72 = arith.addf %69, %71 : vector<16x256xf32>
    %cst_52 = arith.constant 0.000000e+00 : f32
    %73 = vector.broadcast %cst_52 : f32 to vector<16x256xf32>
    %74 = arith.maximumf %72, %73 : vector<16x256xf32>
    %75 = vector.shape_cast %74 : vector<16x256xf32> to vector<2x8x256xf32>
    %cst_53 = arith.constant 0.000000e+00 : f32
    %76 = vector.broadcast %cst_53 : f32 to vector<2x10xf32>
    %77 = vector.extract_strided_slice %75 {offsets = [0, 0, 0], sizes = [2, 1, 256], strides = [1, 1, 1]} : vector<2x8x256xf32> to vector<2x1x256xf32>
    %78 = vector.shape_cast %77 : vector<2x1x256xf32> to vector<2x256xf32>
    %c0_54 = arith.constant 0 : index
    %c0_55 = arith.constant 0 : index
    %c0_56 = arith.constant 0 : index
    %79 = vector.load %arg3[%c0_54, %c0_55, %c0_56] : memref<8x10x256xf32, #tpu.memory_space<vmem>>, vector<1x10x256xf32>
    %80 = vector.shape_cast %79 : vector<1x10x256xf32> to vector<10x256xf32>
    %cst_57 = arith.constant dense<0.000000e+00> : vector<2x10xf32>
    %81 = tpu.matmul %78, %80, %cst_57 {dimension_numbers = #tpu.dot_dimension_numbers<[1], [1], [0], [0], [0, 0, 1, 0], [], []>} : vector<2x256xf32>, vector<10x256xf32>, vector<2x10xf32> -> vector<2x10xf32>
    %82 = arith.addf %76, %81 : vector<2x10xf32>
    %83 = vector.extract_strided_slice %75 {offsets = [0, 1, 0], sizes = [2, 1, 256], strides = [1, 1, 1]} : vector<2x8x256xf32> to vector<2x1x256xf32>
    %84 = vector.shape_cast %83 : vector<2x1x256xf32> to vector<2x256xf32>
    %c1_58 = arith.constant 1 : index
    %c0_59 = arith.constant 0 : index
    %c0_60 = arith.constant 0 : index
    %85 = vector.load %arg3[%c1_58, %c0_59, %c0_60] : memref<8x10x256xf32, #tpu.memory_space<vmem>>, vector<1x10x256xf32>
    %86 = vector.shape_cast %85 : vector<1x10x256xf32> to vector<10x256xf32>
    %cst_61 = arith.constant dense<0.000000e+00> : vector<2x10xf32>
    %87 = tpu.matmul %84, %86, %cst_61 {dimension_numbers = #tpu.dot_dimension_numbers<[1], [1], [0], [0], [0, 0, 1, 0], [], []>} : vector<2x256xf32>, vector<10x256xf32>, vector<2x10xf32> -> vector<2x10xf32>
    %88 = arith.addf %82, %87 : vector<2x10xf32>
    %89 = vector.extract_strided_slice %75 {offsets = [0, 2, 0], sizes = [2, 1, 256], strides = [1, 1, 1]} : vector<2x8x256xf32> to vector<2x1x256xf32>
    %90 = vector.shape_cast %89 : vector<2x1x256xf32> to vector<2x256xf32>
    %c2_62 = arith.constant 2 : index
    %c0_63 = arith.constant 0 : index
    %c0_64 = arith.constant 0 : index
    %91 = vector.load %arg3[%c2_62, %c0_63, %c0_64] : memref<8x10x256xf32, #tpu.memory_space<vmem>>, vector<1x10x256xf32>
    %92 = vector.shape_cast %91 : vector<1x10x256xf32> to vector<10x256xf32>
    %cst_65 = arith.constant dense<0.000000e+00> : vector<2x10xf32>
    %93 = tpu.matmul %90, %92, %cst_65 {dimension_numbers = #tpu.dot_dimension_numbers<[1], [1], [0], [0], [0, 0, 1, 0], [], []>} : vector<2x256xf32>, vector<10x256xf32>, vector<2x10xf32> -> vector<2x10xf32>
    %94 = arith.addf %88, %93 : vector<2x10xf32>
    %95 = vector.extract_strided_slice %75 {offsets = [0, 3, 0], sizes = [2, 1, 256], strides = [1, 1, 1]} : vector<2x8x256xf32> to vector<2x1x256xf32>
    %96 = vector.shape_cast %95 : vector<2x1x256xf32> to vector<2x256xf32>
    %c3_66 = arith.constant 3 : index
    %c0_67 = arith.constant 0 : index
    %c0_68 = arith.constant 0 : index
    %97 = vector.load %arg3[%c3_66, %c0_67, %c0_68] : memref<8x10x256xf32, #tpu.memory_space<vmem>>, vector<1x10x256xf32>
    %98 = vector.shape_cast %97 : vector<1x10x256xf32> to vector<10x256xf32>
    %cst_69 = arith.constant dense<0.000000e+00> : vector<2x10xf32>
    %99 = tpu.matmul %96, %98, %cst_69 {dimension_numbers = #tpu.dot_dimension_numbers<[1], [1], [0], [0], [0, 0, 1, 0], [], []>} : vector<2x256xf32>, vector<10x256xf32>, vector<2x10xf32> -> vector<2x10xf32>
    %100 = arith.addf %94, %99 : vector<2x10xf32>
    %101 = vector.extract_strided_slice %75 {offsets = [0, 4, 0], sizes = [2, 1, 256], strides = [1, 1, 1]} : vector<2x8x256xf32> to vector<2x1x256xf32>
    %102 = vector.shape_cast %101 : vector<2x1x256xf32> to vector<2x256xf32>
    %c4_70 = arith.constant 4 : index
    %c0_71 = arith.constant 0 : index
    %c0_72 = arith.constant 0 : index
    %103 = vector.load %arg3[%c4_70, %c0_71, %c0_72] : memref<8x10x256xf32, #tpu.memory_space<vmem>>, vector<1x10x256xf32>
    %104 = vector.shape_cast %103 : vector<1x10x256xf32> to vector<10x256xf32>
    %cst_73 = arith.constant dense<0.000000e+00> : vector<2x10xf32>
    %105 = tpu.matmul %102, %104, %cst_73 {dimension_numbers = #tpu.dot_dimension_numbers<[1], [1], [0], [0], [0, 0, 1, 0], [], []>} : vector<2x256xf32>, vector<10x256xf32>, vector<2x10xf32> -> vector<2x10xf32>
    %106 = arith.addf %100, %105 : vector<2x10xf32>
    %107 = vector.extract_strided_slice %75 {offsets = [0, 5, 0], sizes = [2, 1, 256], strides = [1, 1, 1]} : vector<2x8x256xf32> to vector<2x1x256xf32>
    %108 = vector.shape_cast %107 : vector<2x1x256xf32> to vector<2x256xf32>
    %c5_74 = arith.constant 5 : index
    %c0_75 = arith.constant 0 : index
    %c0_76 = arith.constant 0 : index
    %109 = vector.load %arg3[%c5_74, %c0_75, %c0_76] : memref<8x10x256xf32, #tpu.memory_space<vmem>>, vector<1x10x256xf32>
    %110 = vector.shape_cast %109 : vector<1x10x256xf32> to vector<10x256xf32>
    %cst_77 = arith.constant dense<0.000000e+00> : vector<2x10xf32>
    %111 = tpu.matmul %108, %110, %cst_77 {dimension_numbers = #tpu.dot_dimension_numbers<[1], [1], [0], [0], [0, 0, 1, 0], [], []>} : vector<2x256xf32>, vector<10x256xf32>, vector<2x10xf32> -> vector<2x10xf32>
    %112 = arith.addf %106, %111 : vector<2x10xf32>
    %113 = vector.extract_strided_slice %75 {offsets = [0, 6, 0], sizes = [2, 1, 256], strides = [1, 1, 1]} : vector<2x8x256xf32> to vector<2x1x256xf32>
    %114 = vector.shape_cast %113 : vector<2x1x256xf32> to vector<2x256xf32>
    %c6_78 = arith.constant 6 : index
    %c0_79 = arith.constant 0 : index
    %c0_80 = arith.constant 0 : index
    %115 = vector.load %arg3[%c6_78, %c0_79, %c0_80] : memref<8x10x256xf32, #tpu.memory_space<vmem>>, vector<1x10x256xf32>
    %116 = vector.shape_cast %115 : vector<1x10x256xf32> to vector<10x256xf32>
    %cst_81 = arith.constant dense<0.000000e+00> : vector<2x10xf32>
    %117 = tpu.matmul %114, %116, %cst_81 {dimension_numbers = #tpu.dot_dimension_numbers<[1], [1], [0], [0], [0, 0, 1, 0], [], []>} : vector<2x256xf32>, vector<10x256xf32>, vector<2x10xf32> -> vector<2x10xf32>
    %118 = arith.addf %112, %117 : vector<2x10xf32>
    %119 = vector.extract_strided_slice %75 {offsets = [0, 7, 0], sizes = [2, 1, 256], strides = [1, 1, 1]} : vector<2x8x256xf32> to vector<2x1x256xf32>
    %120 = vector.shape_cast %119 : vector<2x1x256xf32> to vector<2x256xf32>
    %c7_82 = arith.constant 7 : index
    %c0_83 = arith.constant 0 : index
    %c0_84 = arith.constant 0 : index
    %121 = vector.load %arg3[%c7_82, %c0_83, %c0_84] : memref<8x10x256xf32, #tpu.memory_space<vmem>>, vector<1x10x256xf32>
    %122 = vector.shape_cast %121 : vector<1x10x256xf32> to vector<10x256xf32>
    %cst_85 = arith.constant dense<0.000000e+00> : vector<2x10xf32>
    %123 = tpu.matmul %120, %122, %cst_85 {dimension_numbers = #tpu.dot_dimension_numbers<[1], [1], [0], [0], [0, 0, 1, 0], [], []>} : vector<2x256xf32>, vector<10x256xf32>, vector<2x10xf32> -> vector<2x10xf32>
    %124 = arith.addf %118, %123 : vector<2x10xf32>
    %c0_86 = arith.constant 0 : index
    %c0_87 = arith.constant 0 : index
    %125 = vector.load %arg4[%c0_86, %c0_87] : memref<1x10xf32, #tpu.memory_space<vmem>>, vector<1x10xf32>
    %126 = vector.broadcast %125 : vector<1x10xf32> to vector<2x10xf32>
    %127 = arith.addf %124, %126 : vector<2x10xf32>
    %c0_88 = arith.constant 0 : index
    %c0_89 = arith.constant 0 : index
    %128 = vector.load %arg5[%c0_88, %c0_89] : memref<2x10xf32, #tpu.memory_space<vmem>>, vector<2x10xf32>
    tpu.vector_store %arg5[%c0_88, %c0_89], %127 {strides = array<i32>} : memref<2x10xf32, #tpu.memory_space<vmem>>, vector<2x10xf32>,
    return
  }
}

</mosaic_0001>

<bundles_post_ra>
// kernel: decoupled_model_forward.1
= control target key start
LH: loop header
LB: loop body
LE: loop exit
PB: predicated region body
PF: predicated region fallthrough
CT: control target
= control target key end

     0   :  { %v1840_v1 = vmov 0.0   ;;  %s1841_s20 = smov 17   ;;  %s2200_s0 = inlined_call_operand.vmem [shape: f32[8,256], index: 0, kind: input, shape index: {}]   ;;  %s2201_s1 = inlined_call_operand.vmem [shape: f32[9,16,8], index: 1, kind: input, shape index: {}]   ;;  %s2202_s2 = inlined_call_operand.vmem [shape: f32[16,1], index: 2, kind: input, shape index: {}]   ;;  %s2203_s3 = inlined_call_operand.vmem [shape: f32[8,10,256], index: 3, kind: input, shape index: {}]   ;;  %s2204_s4 = inlined_call_operand.vmem [shape: f32[1,10], index: 4, kind: input, shape index: {}]   ;;  %s2205_s5 = inlined_call_operand.hbm [shape: f32[2,10], index: 5, kind: output, shape index: {}]  }
   0x1   :  { %v1884_v0 = vld [vmem:[%s2200_s0] sm:$0xff]  ;;  %42 = vrot.lane.b32.xlu1 %v1840_v1, %s1841_s20  ;;  %v1891_v2 = vld [vmem:[%s2200_s0 + $0x8] sm:$0xff]  ;;  %225 = vmatprep.mubr.f32.mxu0 %v1840_v1 }
   0x2   :  { %44 = vrot.lane.b32.xlu0 %v1884_v0, %s1841_s20  ;;  %142 = vmatprep.mubr.f32.mxu1 %v1840_v1 }
   0x3   :  { %10 = vsyncpa [#allocation4], 0  ;;  %s1842_s23 = smov 15   ;;  %s1843_s24 = smov 1   ;;  %v950_v3 = vld [vmem:[%s2202_s2] sm:$0xff]  ;;  %v951_v4 = vld [vmem:[%s2202_s2 + $0x8] sm:$0xff]  ;;  %v27_v6 = vlaneseq }
   0x4   :  { %s1844_s0 = smov 127   ;;  %s1845_s25 = smov 113   ;;  %v1849_v5 = vmov 0   ;;  %vm48_vm1 = vcmask 138240   ;;  %v55_v18 = vld [vmem:[%s2201_s1] sm:$0xff]  ;;  %vm71_vm3 = vcmask 64512  }
   0x5   :  { %240 = vrot.lane.b32.xlu1 %v1884_v0, %s1842_s23  ;;  %s1846_s26 = smov 112   ;;  %s1847_s27 = smov 16   ;;  %1814 = vset.pattern.permute.xlu0 %v1849_v5  ;;  %v28_v7 = vand.u32 127, %v27_v6  ;;  %vm244_vm4 = vcmask 121856   ;;  %v56_v26 = vld [vmem:[%s2201_s1 + $0x8] sm:$0xff]  ;;  %vm347_vm7 = vcmask 7168  }
   0x6   :  { %46 = vrot.lane.b32.xlu0 %v1891_v2, %s1841_s20  ;;  %s1848_s28 = smov 111   ;;  %1815 = vset.pattern.permute.xlu1 %v1849_v5  ;;  %v1672_v30 = vld [vmem:[%s2201_s1 + $0x20] sm:$0xff]  ;;  %v1673_v34 = vld [vmem:[%s2201_s1 + $0x28] sm:$0xff]  ;;  %vm546_vm8 = vcmask 1039360   ;;  %v1678_v37 = vld [vmem:[%s2201_s1 + $0x30] sm:$0xff]  ;;  %vm649_vm9 = vcmask 924672  }
   0x7   :  { %v29_v8 = vadd.s32 128, %v28_v7  ;;  %v30_v12 = vand.u32 15, %v28_v7  ;;  %v1679_v41 = vld [vmem:[%s2201_s1 + $0x38] sm:$0xff]  ;;  %v1684_v44 = vld [vmem:[%s2201_s1 + $0x40] sm:$0xff]  ;;  %v1685_v49 = vld [vmem:[%s2201_s1 + $0x48] sm:$0xff]  ;;  %vm66_vm10 = vcmask 130048  }
   0x8   :  { %vm755_vm11 = vcmask 916480   ;;  %v1688_v52 = vld [vmem:[%s2201_s1 + $0x50] sm:$0xff]  ;;  %v1689_v57 = vld [vmem:[%s2201_s1 + $0x58] sm:$0xff]  ;;  %vm853_vm12 = vcmask 908288   ;;  %v1694_v60 = vld [vmem:[%s2201_s1 + $0x60] sm:$0xff]  ;;  %vm984_vm13 = vcmask 1041409  }
   0x9   :  { %238 = vrot.lane.b32.xlu1 %v1840_v1, %s1842_s23  ;;  %v31_v9 = vand.u32 15, %v29_v8  ;;  %vm1927_vm2 = vcmp.ge.s32.totalorder %v30_v12, 1  ;;  %vm1943_vm6 = vcmp.le.s32.totalorder %v30_v12, 14  ;;  %v1664_v59 = vld [vmem:[%s2201_s1 + $0x10] sm:$0xff]  ;;  %v1701_v7 = vld [vmem:[%s2201_s1 + $0x78] sm:$0xff]  ;;  %v1704_v8 = vld [vmem:[%s2201_s1 + $0x80] sm:$0xff] }
   0xa   :  { %242 = vrot.lane.b32.xlu0 %v1891_v2, %s1842_s23  ;;  %v1700_v5 = vld [vmem:[%s2201_s1 + $0x70] sm:$0xff]  ;;  %v1710_v13 = vld [vmem:[%s2203_s3 + $0x20] sm:$0xff]  ;;  %v973_v16 = vld [vmem:[%s2203_s3 + $0x18] sm:$0x3]  ;;  %vm1648_vm14 = vcmask 74752  }
   0xb   :  { %vm1923_vm0 = vcmp.ge.s32.totalorder %v31_v9, 1  ;;  %vm1938_vm5 = vcmp.le.s32.totalorder %v31_v9, 14  ;;  %v1705_v9 = vld [vmem:[%s2201_s1 + $0x88] sm:$0xff] }
   0xd   :  { %345 = vrot.lane.b32.xlu1 %v1891_v2, %s1843_s24 }
   0xe   :  { %343 = vrot.lane.b32.xlu0 %v1884_v0, %s1843_s24 }
  0x11   :  { %542 = vrot.lane.b32.xlu1 %v1891_v2, %s1844_s0 }
  0x12   :  { %341 = vrot.lane.b32.xlu0 %v1840_v1, %s1843_s24  ;;  %s1850_s24 = smov [#allocation3]  }
  0x15   :  { %540 = vrot.lane.b32.xlu1 %v1884_v0, %s1844_s0 }
  0x16   :  { %544 = vrot.lane.b32.xlu0 %v1840_v1, %s1844_s0  ;;  %s1656_s0 = sshll.u32 %s1850_s24, 4  ;;  %s1657_s0 = int_to_ptr.vmem [resolvable:$true] %s1656_s0 }
  0x17   :  { %p1821_p1 = scmp.lt.s32.totalorder %s1657_s0, %s1657_s0 }
  0x19   :  { %647 = vrot.lane.b32.xlu1 %v1840_v1, %s1845_s25 }
  0x1a   :  { %645 = vrot.lane.b32.xlu0 %v1891_v2, %s1845_s25 }
  0x1d   :  { %751 = vrot.lane.b32.xlu1 %v1891_v2, %s1846_s26 }
  0x1e   :  { %643 = vrot.lane.b32.xlu0 %v1884_v0, %s1845_s25  ;;  %s1816_s25 = scalar_lea.vmem %s1657_s0, 32 }
  0x1f   :  { %p1817_p0 = scmp.ne.s32.totalorder %s1657_s0, %s1816_s25  ;;  %p1822_p2 = scmp.lt.s32.totalorder %s1816_s25, %s1816_s25 }
  0x21   :  { %749 = vrot.lane.b32.xlu1 %v1884_v0, %s1846_s26  ;;  %p1823_p3 = por %p1822_p2, %p1821_p1 }
  0x22   :  { %753 = vrot.lane.b32.xlu0 %v1840_v1, %s1846_s26 }
  0x23   :  { %p1824_p4 = pnand %p1823_p3, %p1817_p0 }
  0x25   :  { %64 = vrot.lane.b32.xlu1 %v1891_v2, %s1847_s27 }
  0x26   :  { %62 = vrot.lane.b32.xlu0 %v1884_v0, %s1847_s27 }
  0x29   :  { %851 = vrot.lane.b32.xlu1 %v1840_v1, %s1848_s28 }
  0x2a   :  { %849 = vrot.lane.b32.xlu0 %v1891_v2, %s1848_s28 }
  0x2d   :  { %847 = vrot.lane.b32.xlu1 %v1884_v0, %s1848_s28 }
  0x2e   :  { %60 = vrot.lane.b32.xlu0 %v1840_v1, %s1847_s27 }
  0x31   :  { %959 = vperm.xlu1 %1815, %v951_v4  }
  0x32   :  { %954 = vperm.xlu0 %1814, %v950_v3   ;;  %v1695_v3 = vld [vmem:[%s2201_s1 + $0x68] sm:$0xff] }
  0x73   :  { %v43_v10 = vpop.permute.xlu1 %42 }
  0x74   :  { %v45_v11 = vpop.permute.xlu0 %44 }
  0x75   :  { %v49_v19 = vsel %vm48_vm1, %v43_v10, %v45_v11  ;;  %v1711_v10 = vld [vmem:[%s2203_s3 + $0x28] sm:$0xff] }
  0x77   :  { %v241_v14 = vpop.permute.xlu1 %240 }
  0x78   :  { %v47_v15 = vpop.permute.xlu0 %46 }
  0x79   :  { %v50_v17 = vsel %vm48_vm1, %v45_v11, %v47_v15  ;;  %v1713_v11 = vld [vmem:[%s2203_s3 + $0x38] sm:$0x3]  ;;  %v971_v15 = vld [vmem:[%s2203_s3 + $0x8] sm:$0xff] }
  0x7a   :  { %1668 = vmatprep.subr.msk.mxu0 %vm1923_vm0, %v50_v17  ;;  %v1739_v12 = vpack.c.bf16 %v1713_v11, %v1711_v10  ;;  %v1743_v17 = vpack.c.bf16 %v973_v16, %v971_v15  ;;  %v1716_v15 = vld [vmem:[%s2203_s3 + $0x50] sm:$0x3] }
  0x7b   :  { %1669 = vmatpush1.msk.msra.mxu0 %vm1927_vm2, %v49_v19  ;;  %v239_v21 = vpop.permute.xlu1 %238 }
  0x7c   :  { %1670 = vmatmul.mubr.msk.f32.vlgmr.msra.gmra.mrb[0].mxu0 %vm71_vm3, %v55_v18  ;;  %v243_v22 = vpop.permute.xlu0 %242  ;;  %v245_v24 = vsel %vm244_vm4, %v239_v21, %v241_v14 }
  0x7d   :  { %v246_v25 = vsel %vm244_vm4, %v241_v14, %v243_v22  ;;  %231 = vmatprep.mubr.f32.mxu0 %v1840_v1 }
  0x7e   :  { %1674 = vmatprep.subr.msk.mxu0 %vm1938_vm5, %v246_v25 }
  0x7f   :  { %1675 = vmatpush1.msk.msra.mxu0 %vm1943_vm6, %v245_v24  ;;  %v346_v28 = vpop.permute.xlu1 %345 }
  0x80   :  { %1671 = vmatmul.mubr.msk.f32.gmra.mrb[2].mxu0 %vm71_vm3, %v56_v26  ;;  %v344_v27 = vpop.permute.xlu0 %343 }
  0x81   :  { %v349_v29 = vsel %vm347_vm7, %v344_v27, %v346_v28  ;;  %324 = vmatprep.mubr.f32.mxu0 %v1840_v1 }
  0x82   :  { %1680 = vmatprep.subr.msk.mxu0 %vm1923_vm0, %v349_v29  ;;  %v972_v29 = vld [vmem:[%s2203_s3 + $0x10] sm:$0x3] }
  0x83   :  { %v543_v32 = vpop.permute.xlu1 %542 }
  0x84   :  { %1676 = vmatmul.mubr.msk.f32.vlgmr.msra.gmra.mrb[0].mxu0 %vm71_vm3, %v1672_v30  ;;  %v342_v31 = vpop.permute.xlu0 %341  ;;  %v1715_v30 = vld [vmem:[%s2203_s3 + $0x48] sm:$0xff] }
  0x85   :  { %v348_v33 = vsel %vm347_vm7, %v342_v31, %v344_v27  ;;  %330 = vmatprep.mubr.f32.mxu0 %v1840_v1  ;;  %v970_v27 = vld [vmem:[%s2203_s3] sm:$0xff]  ;;  %v1717_v31 = vld [vmem:[%s2203_s3 + $0x58] sm:$0x3] }
  0x86   :  { %1681 = vmatpush1.msk.msra.mxu0 %vm1927_vm2, %v348_v33 }
  0x87   :  { %453 = vmatprep.subr.mxu0 %v1891_v2  ;;  %v541_v36 = vpop.permute.xlu1 %540  ;;  %v1665_v2 = vld [vmem:[%s2201_s1 + $0x18] sm:$0xff] }
  0x88   :  { %1677 = vmatmul.mubr.msk.f32.gmra.mrb[2].mxu0 %vm71_vm3, %v1673_v34  ;;  %v545_v35 = vpop.permute.xlu0 %544  ;;  %v547_v45 = vsel %vm546_vm8, %v541_v36, %v543_v32 }
  0x89   :  { %427 = vmatprep.mubr.f32.mxu0 %v1840_v1  ;;  %v548_v38 = vsel %vm546_vm8, %v543_v32, %v545_v35 }
  0x8b   :  { %v648_v40 = vpop.permute.xlu1 %647 }
  0x8c   :  { %1682 = vmatmul.mubr.msk.f32.vlgmr.msra.gmra.mrb[0].mxu0 %vm71_vm3, %v1678_v37  ;;  %v646_v39 = vpop.permute.xlu0 %645 }
  0x8d   :  { %433 = vmatprep.mubr.f32.mxu0 %v1840_v1  ;;  %454 = vmatpush1.msra.mxu0 %v1884_v0  ;;  %v651_v46 = vsel %vm649_vm9, %v646_v39, %v648_v40  ;;  %v1745_v40 = vpack.c.bf16 %v972_v29, %v970_v27 }
  0x8e   :  { %1690 = vmatprep.subr.msk.mxu0 %vm1938_vm5, %v548_v38 }
  0x8f   :  { %v752_v43 = vpop.permute.xlu1 %751 }
  0x90   :  { %1683 = vmatmul.mubr.msk.f32.gmra.mrb[2].mxu0 %vm71_vm3, %v1679_v41  ;;  %v644_v42 = vpop.permute.xlu0 %643  ;;  %v1747_v41 = vpack.c.bf16 %v1717_v31, %v1715_v30 }
  0x91   :  { %517 = vmatprep.mubr.f32.mxu0 %v1840_v1  ;;  %v650_v54 = vsel %vm649_vm9, %v644_v42, %v646_v39 }
  0x93   :  { %v750_v48 = vpop.permute.xlu1 %749 }
  0x94   :  { %1686 = vmatmul.mubr.msk.f32.vlgmr.msra.gmra.mrb[0].mxu0 %vm71_vm3, %v1684_v44  ;;  %v754_v47 = vpop.permute.xlu0 %753  ;;  %v756_v63 = vsel %vm755_vm11, %v750_v48, %v752_v43 }
  0x95   :  { %1691 = vmatpush1.msk.msra.mxu0 %vm1943_vm6, %v547_v45  ;;  %523 = vmatprep.mubr.f32.mxu0 %v1840_v1  ;;  %v757_v55 = vsel %vm755_vm11, %v752_v43, %v754_v47 }
  0x96   :  { %1696 = vmatprep.subr.msk.mxu0 %vm1923_vm0, %v651_v46 }
  0x97   :  { %v65_v51 = vpop.permute.xlu1 %64 }
  0x98   :  { %1687 = vmatmul.mubr.msk.f32.gmra.mrb[2].mxu0 %vm71_vm3, %v1685_v49  ;;  %v63_v50 = vpop.permute.xlu0 %62 }
  0x99   :  { %626 = vmatprep.mubr.f32.mxu0 %v1840_v1  ;;  %v68_v53 = vsel %vm66_vm10, %v63_v50, %v65_v51 }
  0x9a   :  { %78 = vmatprep.subr.mxu1 %v68_v53 }
  0x9b   :  { %v852_v61 = vpop.permute.xlu1 %851 }
  0x9c   :  { %1692 = vmatmul.mubr.msk.f32.vlgmr.msra.gmra.mrb[0].mxu0 %vm71_vm3, %v1688_v52  ;;  %v850_v56 = vpop.permute.xlu0 %849 }
  0x9d   :  { %1697 = vmatpush1.msk.msra.mxu0 %vm1927_vm2, %v650_v54  ;;  %632 = vmatprep.mubr.f32.mxu0 %v1840_v1  ;;  %v855_v0 = vsel %vm853_vm12, %v850_v56, %v852_v61 }
  0x9e   :  { %766 = vmatprep.subr.mxu0 %v757_v55 }
  0x9f   :  { %v848_v4 = vpop.permute.xlu1 %847 }
  0xa0   :  { %1693 = vmatmul.mubr.msk.f32.gmra.mrb[2].mxu0 %vm71_vm3, %v1689_v57  ;;  %v61_v58 = vpop.permute.xlu0 %60  ;;  %v854_v6 = vsel %vm853_vm12, %v848_v4, %v850_v56 }
  0xa1   :  { %729 = vmatprep.mubr.f32.mxu0 %v1840_v1  ;;  %v67_v62 = vsel %vm66_vm10, %v61_v58, %v63_v50 }
  0xa2   :  { %79 = vmatpush1.msra.mxu1 %v67_v62 }
  0xa3   :  { %1666 = vmatmul.mubr.msk.f32.vlgmr.msra.gmra.mrb[0].mxu1 %vm71_vm3, %v1664_v59  ;;  %1740 = vmatprep.subr.bf16.mxu1 %v1739_v12 }
  0xa4   :  { %1698 = vmatmul.mubr.msk.f32.vlgmr.msra.gmra.mrb[0].mxu0 %vm71_vm3, %v1694_v60  ;;  %148 = vmatprep.mubr.f32.mxu1 %v1840_v1 }
  0xa5   :  { %767 = vmatpush1.msra.mxu0 %v756_v63  ;;  %735 = vmatprep.mubr.f32.mxu0 %v1840_v1 }
  0xa6   :  { %1706 = vmatprep.subr.msk.mxu0 %vm1938_vm5, %v855_v0 }
  0xa7   :  { %1667 = vmatmul.mubr.msk.f32.gmra.mrb[2].mxu1 %vm71_vm3, %v1665_v2 }
  0xa8   :  { %1699 = vmatmul.mubr.msk.f32.gmra.mrb[2].mxu0 %vm71_vm3, %v1695_v3 }
  0xa9   :  { %830 = vmatprep.mubr.f32.mxu0 %v1840_v1 }
  0xac   :  { %1702 = vmatmul.mubr.msk.f32.vlgmr.msra.gmra.mrb[0].mxu0 %vm71_vm3, %v1700_v5 }
  0xad   :  { %1707 = vmatpush1.msk.msra.mxu0 %vm1943_vm6, %v854_v6  ;;  %836 = vmatprep.mubr.f32.mxu0 %v1840_v1 }
  0xb0   :  { %1703 = vmatmul.mubr.msk.f32.gmra.mrb[2].mxu0 %vm71_vm3, %v1701_v7  ;;  %v960_v34 = vpop.permute.xlu1 %959 }
  0xb1   :  { %933 = vmatprep.mubr.f32.mxu0 %v1840_v1  ;;  %v955_v23 = vpop.permute.xlu0 %954 }
  0xb4   :  { %1708 = vmatmul.mubr.msk.f32.vlgmr.msra.gmra.mrb[0].mxu0 %vm71_vm3, %v1704_v8 }
  0xb5   :  { %939 = vmatprep.mubr.f32.mxu0 %v1840_v1  ;;  %v1712_v1 = vld [vmem:[%s2203_s3 + $0x30] sm:$0x3] }
  0xb6   :  { %v1741_v14 = vpack.c.bf16 %v1712_v1, %v1710_v13 }
  0xb8   :  { %1709 = vmatmul.mubr.msk.f32.gmra.mrb[2].mxu0 %vm71_vm3, %v1705_v9  ;;  %1742 = vmatpush1.bf16.xpose.msra.mxu1 %v1741_v14  ;;  %v1714_v14 = vld [vmem:[%s2203_s3 + $0x40] sm:$0xff] }
  0xb9   :  { %1744 = vmatprep.subr.bf16.mxu1 %v1743_v17  ;;  %v1749_v29 = vpack.c.bf16 %v1716_v15, %v1714_v14 }
 0x176   :  { %v144_v18 = vpop.f32.mrb[0].mxu1 }
 0x177   :  { %v146_v19 = vpop.f32.mrb[1].mxu1 }
 0x17a   :  { %v150_v20 = vpop.f32.mrb[2].mxu1 }
 0x17b   :  { %v152_v21 = vpop.f32.mrb[3].mxu1 }
 0x187   :  { %v935_v22 = vpop.f32.mrb[0].mxu0 }
 0x188   :  { %v1771_v24 = vadd.f32 %v935_v22, %v144_v18  ;;  %v937_v25 = vpop.f32.mrb[1].mxu0 }
 0x189   :  { %v1772_v26 = vadd.f32 %v937_v25, %v146_v19 }
 0x18a   :  { %v962_v28 = vadd.f32 %v1771_v24, %v955_v23 }
 0x18b   :  { %v963_v32 = vadd.f32 %v1772_v26, %v955_v23  ;;  %v941_v33 = vpop.f32.mrb[2].mxu0 }
 0x18c   :  { %v2093_v35 = vmax.f32 %v962_v28, 0.0  ;;  %v1773_v36 = vadd.f32 %v941_v33, %v150_v20  ;;  %v943_v37 = vpop.f32.mrb[3].mxu0  ;;  %v1719_v20 = vld [vmem:[%s2203_s3 + $0x68] sm:$0xff]  ;;  %v1720_v33 = vld [vmem:[%s2203_s3 + $0x70] sm:$0x3] }
 0x18d   :  { %v967_v38 = vmax.f32 %v963_v32, 0.0  ;;  %v1774_v39 = vadd.f32 %v943_v37, %v152_v21  ;;  %v1721_v21 = vld [vmem:[%s2203_s3 + $0x78] sm:$0x3]  ;;  %v1718_v32 = vld [vmem:[%s2203_s3 + $0x60] sm:$0xff] }
 0x18e   :  { %v964_v42 = vadd.f32 %v1773_v36, %v960_v34  ;;  %v983_v43 = vrot.slane %v2093_v35, 1  ;;  %v1141_v44 = vrot.slane %v2093_v35, 2  ;;  %v1225_v45 = vrot.slane %v2093_v35, 3 }
 0x18f   :  { %v965_v46 = vadd.f32 %v1774_v39, %v960_v34  ;;  %v986_v47 = vrot.slane %v967_v38, 1  ;;  %v1144_v48 = vrot.slane %v967_v38, 2  ;;  %v1228_v49 = vrot.slane %v967_v38, 3  ;;  %v1723_v34 = vld [vmem:[%s2203_s3 + $0x88] sm:$0xff]  ;;  %v1724_v39 = vld [vmem:[%s2203_s3 + $0x90] sm:$0x3] }
 0x190   :  { %v968_v50 = vmax.f32 %v964_v42, 0.0  ;;  %v1312_v51 = vrot.slane %v967_v38, 4  ;;  %v1309_v52 = vrot.slane %v2093_v35, 4  ;;  %v1396_v53 = vrot.slane %v967_v38, 5 }
 0x191   :  { %v969_v54 = vmax.f32 %v965_v46, 0.0  ;;  %v1393_v55 = vrot.slane %v2093_v35, 5  ;;  %v1480_v56 = vrot.slane %v967_v38, 6  ;;  %v1477_v57 = vrot.slane %v2093_v35, 6  ;;  %v1731_v46 = vld [vmem:[%s2203_s3 + $0xc8] sm:$0xff] }
 0x192   :  { %v985_v58 = vsel %vm984_vm13, %v968_v50, %v983_v43  ;;  %v1060_v59 = vrot.slane %v968_v50, 7  ;;  %v1142_v60 = vrot.slane %v968_v50, 1  ;;  %v1226_v61 = vrot.slane %v968_v50, 2 }
 0x193   :  { %v987_v62 = vsel %vm984_vm13, %v969_v54, %v986_v47  ;;  %v1062_v63 = vrot.slane %v969_v54, 7  ;;  %v1145_v0 = vrot.slane %v969_v54, 1  ;;  %v1229_v2 = vrot.slane %v969_v54, 2  ;;  %v1733_v47 = vld [vmem:[%s2203_s3 + $0xd8] sm:$0x3] }
 0x194   :  { %1054 = vmatprep.mubr.f32.mxu1 %v987_v62  ;;  %v1061_v3 = vsel %vm984_vm13, %v1060_v59, %v2093_v35  ;;  %v1143_v4 = vsel %vm984_vm13, %v1142_v60, %v1141_v44  ;;  %v1227_v5 = vsel %vm984_vm13, %v1226_v61, %v1225_v45  ;;  %v1313_v6 = vrot.slane %v969_v54, 3  ;;  %v1726_v44 = vld [vmem:[%s2203_s3 + $0xa0] sm:$0xff]  ;;  %v1728_v45 = vld [vmem:[%s2203_s3 + $0xb0] sm:$0x3] }
 0x195   :  { %1055 = vmatmul.mubr.f32.vlgmr.msra.gmra.mrb[4].mxu1 %v985_v58  ;;  %v1063_v7 = vsel %vm984_vm13, %v1062_v63, %v967_v38  ;;  %v1146_v8 = vsel %vm984_vm13, %v1145_v0, %v1144_v48  ;;  %v1230_v9 = vsel %vm984_vm13, %v1229_v2, %v1228_v49  ;;  %v1310_v10 = vrot.slane %v968_v50, 3 }
 0x196   :  { %1746 = vmatpush1.bf16.xpose.msra.mxu1 %v1745_v40  ;;  %1130 = vmatprep.mubr.f32.mxu1 %v1063_v7  ;;  %v1314_v11 = vsel %vm984_vm13, %v1313_v6, %v1312_v51  ;;  %v1397_v12 = vrot.slane %v969_v54, 4  ;;  %v1394_v13 = vrot.slane %v968_v50, 4  ;;  %v1481_v1 = vrot.slane %v969_v54, 5  ;;  %v1727_v40 = vld [vmem:[%s2203_s3 + $0xa8] sm:$0xff]  ;;  %v1732_v51 = vld [vmem:[%s2203_s3 + $0xd0] sm:$0x3] }
 0x197   :  { %1748 = vmatprep.subr.bf16.mxu1 %v1747_v41  ;;  %v1311_v16 = vsel %vm984_vm13, %v1310_v10, %v1309_v52  ;;  %v1478_v17 = vrot.slane %v968_v50, 5  ;;  %v1564_v18 = vrot.slane %v967_v38, 7  ;;  %v1565_v19 = vrot.slane %v969_v54, 6  ;;  %v1722_v38 = vld [vmem:[%s2203_s3 + $0x80] sm:$0xff]  ;;  %v1729_v41 = vld [vmem:[%s2203_s3 + $0xb8] sm:$0x3] }
 0x198   :  { %v1398_v22 = vsel %vm984_vm13, %v1397_v12, %v1396_v53  ;;  %v1395_v23 = vsel %vm984_vm13, %v1394_v13, %v1393_v55  ;;  %v1482_v24 = vsel %vm984_vm13, %v1481_v1, %v1480_v56  ;;  %v1561_v27 = vrot.slane %v2093_v35, 7  ;;  %v1725_v35 = vld [vmem:[%s2203_s3 + $0x98] sm:$0x3]  ;;  %v1735_v52 = vld [vmem:[%s2203_s3 + $0xe8] sm:$0xff]  ;;  %v1734_v56 = vld [vmem:[%s2203_s3 + $0xe0] sm:$0xff] }
 0x199   :  { %v1479_v25 = vsel %vm984_vm13, %v1478_v17, %v1477_v57  ;;  %v1566_v26 = vsel %vm984_vm13, %v1565_v19, %v1564_v18  ;;  %v1562_v28 = vrot.slane %v968_v50, 6  ;;  %v1751_v30 = vpack.c.bf16 %v1721_v21, %v1719_v20  ;;  %v1730_v50 = vld [vmem:[%s2203_s3 + $0xc0] sm:$0xff]  ;;  %v1737_v53 = vld [vmem:[%s2203_s3 + $0xf8] sm:$0x3]  ;;  %v1736_v57 = vld [vmem:[%s2203_s3 + $0xf0] sm:$0x3] }
 0x19a   :  { %v1753_v36 = vpack.c.bf16 %v1720_v33, %v1718_v32  ;;  %v1755_v37 = vpack.c.bf16 %v1725_v35, %v1723_v34  ;;  %v1757_v42 = vpack.c.bf16 %v1724_v39, %v1722_v38  ;;  %v1759_v43 = vpack.c.bf16 %v1729_v41, %v1727_v40 }
 0x19b   :  { %v1563_v31 = vsel %vm984_vm13, %v1562_v28, %v1561_v27  ;;  %v1761_v48 = vpack.c.bf16 %v1728_v45, %v1726_v44  ;;  %v1763_v49 = vpack.c.bf16 %v1733_v47, %v1731_v46  ;;  %v1765_v54 = vpack.c.bf16 %v1732_v51, %v1730_v50 }
 0x19c   :  { %v1767_v55 = vpack.c.bf16 %v1737_v53, %v1735_v52  ;;  %v1769_v58 = vpack.c.bf16 %v1736_v57, %v1734_v56 }
 0x19d   :  { %1131 = vmatmul.mubr.f32.vlgmr.msra.gmra.mrb[6].mxu1 %v1061_v3 }
 0x19e   :  { %1750 = vmatpush1.bf16.xpose.msra.mxu1 %v1749_v29  ;;  %1213 = vmatprep.mubr.f32.mxu1 %v1146_v8 }
 0x19f   :  { %1752 = vmatprep.subr.bf16.mxu1 %v1751_v30 }
 0x1a5   :  { %1214 = vmatmul.mubr.f32.vlgmr.msra.gmra.mrb[8].mxu1 %v1143_v4 }
 0x1a6   :  { %1754 = vmatpush1.bf16.xpose.msra.mxu1 %v1753_v36  ;;  %1297 = vmatprep.mubr.f32.mxu1 %v1230_v9 }
 0x1a7   :  { %1756 = vmatprep.subr.bf16.mxu1 %v1755_v37 }
 0x1ad   :  { %1298 = vmatmul.mubr.f32.vlgmr.msra.gmra.mrb[10].mxu1 %v1227_v5 }
 0x1ae   :  { %1758 = vmatpush1.bf16.xpose.msra.mxu1 %v1757_v42  ;;  %1381 = vmatprep.mubr.f32.mxu1 %v1314_v11 }
 0x1af   :  { %1760 = vmatprep.subr.bf16.mxu1 %v1759_v43 }
 0x1b5   :  { %1382 = vmatmul.mubr.f32.vlgmr.msra.gmra.mrb[12].mxu1 %v1311_v16  ;;  %v1738_v16 = vld [vmem:[%s2204_s4] ss:$0 sm:$0xff] }
 0x1b6   :  { %1762 = vmatpush1.bf16.xpose.msra.mxu1 %v1761_v48  ;;  %1465 = vmatprep.mubr.f32.mxu1 %v1398_v22 }
 0x1b7   :  { %1764 = vmatprep.subr.bf16.mxu1 %v1763_v49 }
 0x1bd   :  { %1466 = vmatmul.mubr.f32.vlgmr.msra.gmra.mrb[14].mxu1 %v1395_v23 }
 0x1be   :  { %1766 = vmatpush1.bf16.xpose.msra.mxu1 %v1765_v54  ;;  %1549 = vmatprep.mubr.f32.mxu1 %v1482_v24 }
 0x1bf   :  { %1768 = vmatprep.subr.bf16.mxu1 %v1767_v55 }
 0x1c5   :  { %1550 = vmatmul.mubr.f32.vlgmr.msra.gmra.mrb[16].mxu1 %v1479_v25 }
 0x1c6   :  { %1770 = vmatpush1.bf16.xpose.msra.mxu1 %v1769_v58  ;;  %1633 = vmatprep.mubr.f32.mxu1 %v1566_v26 }
 0x1cd   :  { %1634 = vmatmul.mubr.f32.vlgmr.msra.gmra.mrb[18].mxu1 %v1563_v31 }
 0x268   :  { %v1056_v59 = vpop.f32.mrb[4].mxu1 }
 0x269   :  { %v1058_v60 = vpop.f32.mrb[5].mxu1 }
 0x270   :  { %v1132_v61 = vpop.f32.mrb[6].mxu1 }
 0x271   :  { %v1133_v62 = vadd.f32 %v1132_v61, %v1056_v59  ;;  %v1134_v63 = vpop.f32.mrb[7].mxu1 }
 0x278   :  { %v1215_v0 = vpop.f32.mrb[8].mxu1 }
 0x279   :  { %v1219_v2 = vadd.f32 %v1215_v0, %v1133_v62  ;;  %v1217_v3 = vpop.f32.mrb[9].mxu1 }
 0x280   :  { %v1299_v4 = vpop.f32.mrb[10].mxu1 }
 0x281   :  { %v1303_v5 = vadd.f32 %v1299_v4, %v1219_v2  ;;  %v1301_v6 = vpop.f32.mrb[11].mxu1 }
 0x288   :  { %v1383_v7 = vpop.f32.mrb[12].mxu1 }
 0x289   :  { %v1387_v8 = vadd.f32 %v1383_v7, %v1303_v5  ;;  %v1385_v9 = vpop.f32.mrb[13].mxu1 }
 0x290   :  { %v1467_v10 = vpop.f32.mrb[14].mxu1 }
 0x291   :  { %v1471_v11 = vadd.f32 %v1467_v10, %v1387_v8  ;;  %v1469_v12 = vpop.f32.mrb[15].mxu1 }
 0x298   :  { %v1551_v13 = vpop.f32.mrb[16].mxu1 }
 0x299   :  { %v1555_v1 = vadd.f32 %v1551_v13, %v1471_v11  ;;  %v1553_v14 = vpop.f32.mrb[17].mxu1 }
 0x2a0   :  { %v1635_v15 = vpop.f32.mrb[18].mxu1 }
 0x2a1   :  { %v1639_v17 = vadd.f32 %v1635_v15, %v1555_v1  ;;  %v1637_v18 = vpop.f32.mrb[19].mxu1 }
 0x2a3   :  { %v1647_v19 = vadd.f32 %v1738_v16, %v1639_v17 }
 0x2a5   :  { %1649 = vst.msk [vmem:[#allocation3] sm:$0x3] %vm1648_vm14, %v1647_v19 }
 0x2a6   :  { %1827 = shalt.err (!%p1824_p4)
}
 0x2a7   :  { %s1828_s28 = scalar_lea.hbm %s2205_s5, 32 }
 0x2a8   :  { %p1829_p5 = scmp.ne.s32.totalorder %s2205_s5, %s1828_s28  ;;  %p1832_p6 = scmp.lt.u32.totalorder %s1828_s28, %s2205_s5 }
 0x2aa   :  { %p1834_p7 = pnand %p1832_p6, %p1829_p5 }
 0x2ac   :  { %1837 = shalt.err (!%p1834_p7)
}
 0x2ad   :  { %1659 = dma.vmem_to_hbm [thread:$0]  %s1657_s0, 32, %s2205_s5, [#allocation4]  }
 0x2ae   :  { %1838 = dma.done.wait [#allocation4], 32  }
 0x2af   :  { %1839 = vsyncadd [#allocation4], 4294967264 }
 0x2b0   :  { %1663 = vsyncpa [#allocation4], 1 }

</bundles_post_ra>
